<compile_context>
chip_gen: v6e
topology: v6e:2x2x1
jax: 0.10.0
libtpu: 0.0.40
codegen_flags: <defaults>
</compile_context>

<pallas_src>
import functools

import jax
import jax.numpy as jnp
from jax import lax
from jax.experimental import pallas as pl
from jax.experimental.pallas import tpu as pltpu

NEG_SLOPE = 0.2   # DGL GATConv default LeakyReLU negative slope
LANE = 128
SUBLANE = 8


def _round_up(x, m):
    return (x + m - 1) // m * m


def _critic_kernel(nn_ref, x_ref, adj_ref,
                   waug1_ref, alw1_ref, b1_ref,
                   waug2_ref, alw2_ref, b2_ref,
                   wf_ref, bf_ref, o_ref, *, h_pad):
    """Whole Critic forward for ONE graph of the batch (grid axis = graph).

    adj_ref[dst, src] != 0  <=>  edge src -> dst (int8 0/1 mask).
    waug*_ref = [W | W @ attn_r^T]  (projection with the per-dst 'er' dot folded in).
    alw*_ref  = attn_l @ W^T        (so el[src] = <alw, h[src]> -> one rank-1 NT dot).
    nn_ref[b] = number of real (non-padded) nodes of graph b (SMEM scalar prefetch).
    """
    n_real = nn_ref[pl.program_id(0)]
    adj = adj_ref[...].astype(jnp.float32)                          # (N, N) 0/1
    mask = adj > 0.0

    def gat_layer(h, waug_ref, alw_ref, b_ref):
        h_bf = h.astype(jnp.bfloat16)
        # Projection with the per-dst attention dot folded in: [h@W | h@(W a_r)].
        feataug = jnp.dot(h_bf, waug_ref[...],
                          preferred_element_type=jnp.float32)       # (N, H+1) f32
        feat = feataug[:, :h_pad]                                   # (N, H)
        er = feataug[:, h_pad:h_pad + 1]                            # (N, 1)  er[dst]
        # Per-src dot in row form with ONE tiny rank-1 NT matmul
        # (flash-attention 'qd,kd->qk' pattern): no O(N^2*K) work, no (N,K)
        # broadcast materialisation.
        el = lax.dot_general(alw_ref[...], h_bf, (((1,), (1,)), ((), ())),
                             preferred_element_type=jnp.float32)    # (1, N)  el[src]
        e = er + el                                                 # e[dst, src]
        e = jnp.where(e > 0, e, NEG_SLOPE * e)                      # LeakyReLU(0.2)
        e = jnp.where(mask, e, jnp.float32(-1e30))                  # mask non-edges
        m = jnp.max(e, axis=-1, keepdims=True)                      # max over edges only
        p = jnp.exp(e - m) * adj                                    # unnormalised attn
        s = jnp.sum(p, axis=-1, keepdims=True)                      # (N, 1)
        rst = jnp.dot(p.astype(jnp.bfloat16), feat.astype(jnp.bfloat16),
                      preferred_element_type=jnp.float32)           # (N, H)
        # Deferred softmax normalisation: (N,H) multiply instead of an (N,N)
        # divide.  s >= 1 for any dst with an in-edge (row max of exp(e-m) on
        # edges is exactly 1), so the clamp only touches zero-in-degree rows,
        # where rst == 0 -> output = relu(bias) (allow_zero_in_degree=True).
        inv_s = pl.reciprocal(jnp.maximum(s, 1.0), approx=False)
        return jnp.maximum(rst * inv_s + b_ref[...], 0.0)           # + bias, ReLU

    h1 = gat_layer(x_ref[...], waug1_ref, alw1_ref, b1_ref)
    h2 = gat_layer(h1, waug2_ref, alw2_ref, b2_ref)

    # Mean over this graph's *real* nodes, then the final Linear (same kernel).
    row = lax.broadcasted_iota(jnp.int32, h2.shape, 0)
    keep = (row < n_real).astype(jnp.float32)                       # (N, H) 0/1
    cnt = jnp.sum(keep, axis=0, keepdims=True)                      # (1, H) == n_real
    hg = jnp.sum(h2 * keep, axis=0, keepdims=True) * pl.reciprocal(cnt, approx=False)
    o_ref[...] = jnp.dot(hg.astype(jnp.bfloat16), wf_ref[...],
                         preferred_element_type=jnp.float32) + bf_ref[...]


def critic_forward(params, features, adj, n_nodes=None):
    """Critic forward.

    features: (B, N, in_dim) or (N, in_dim) f32 node features (padded rows free).
    adj:      (B, N, N) or (N, N); adj[.., dst, src] != 0 iff edge src -> dst
              (treated as a BINARY mask, like GATConv).
    n_nodes:  (B,) int32 real node count per graph (default: N for every graph).
    Returns (B, out_dim) for batched input, (1, out_dim) for a single graph.
    """
    single = features.ndim == 2
    if single:
        features, adj = features[None], adj[None]
    B, n, in_dim = features.shape
    hidden = params["w1"].shape[1]
    out_dim = params["wf"].shape[1]
    if n_nodes is None:
        n_nodes = jnp.full((B,), n, jnp.int32)
    n_nodes = jnp.asarray(n_nodes, jnp.int32)

    n_pad = _round_up(max(n, 1), SUBLANE)
    in_pad = _round_up(in_dim, LANE)
    h_pad = _round_up(hidden, LANE)
    out_pad = _round_up(out_dim, LANE)

    x = jnp.zeros((B, n_pad, in_pad), jnp.float32).at[:, :n, :in_dim].set(features)
    # int8 binary structural mask: halves (vs bf16) the only O(N^2) HBM input
    # and makes the "adjacency is 0/1" assumption explicit.
    adj_p = jnp.zeros((B, n_pad, n_pad), jnp.int8).at[:, :n, :n].set(
        (adj > 0).astype(jnp.int8))

    def prep(w, al, ar, b, k_pad):
        k = w.shape[0]
        waug = jnp.zeros((k_pad, h_pad + 1), jnp.float32)
        waug = waug.at[:k, :hidden].set(w)
        waug = waug.at[:k, h_pad].set(w @ ar[0])                    # folded er column
        alw = jnp.zeros((1, k_pad), jnp.float32).at[:, :k].set(al @ w.T)
        bp = jnp.zeros((1, h_pad), jnp.float32).at[:, :hidden].set(b)
        # bf16 MXU operands, f32 accumulation happens in-kernel.
        return waug.astype(jnp.bfloat16), alw.astype(jnp.bfloat16), bp

    waug1, alw1, b1 = prep(params["w1"], params["al1"], params["ar1"],
                           params["b1"], in_pad)
    waug2, alw2, b2 = prep(params["w2"], params["al2"], params["ar2"],
                           params["b2"], h_pad)
    wf = jnp.zeros((h_pad, out_pad), jnp.float32
                   ).at[:hidden, :out_dim].set(params["wf"]).astype(jnp.bfloat16)
    bf = jnp.zeros((1, out_pad), jnp.float32).at[:, :out_dim].set(params["bf"])

    # ----- scheduling hints: shape-derived VMEM budget + cost estimate -----
    F32, BF16, I8 = 4, 2, 1
    weight_bytes = ((waug1.size + alw1.size + waug2.size + alw2.size + wf.size) * BF16
                    + (b1.size + b2.size + bf.size) * F32)
    per_graph_in = n_pad * in_pad * F32 + n_pad * n_pad * I8
    temporaries = 3 * n_pad * n_pad * F32 + 8 * n_pad * h_pad * F32
    vmem_needed = 2 * per_graph_in + weight_bytes + temporaries + (2 << 20)
    try:
        phys_vmem = pltpu.get_tpu_info().vmem_capacity_bytes
    except Exception:                      # conservative fallback = v7x (64 MiB)
        phys_vmem = 64 * 1024 * 1024
    vmem_limit = int(min(max(vmem_needed, 32 * 1024 * 1024), int(phys_vmem * 0.75)))

    flops = B * (2 * n_pad * in_pad * (h_pad + 2)        # layer-1 proj + el
                 + 2 * n_pad * h_pad * (h_pad + 2)        # layer-2 proj + el
                 + 4 * n_pad * n_pad * h_pad              # 2x p @ feat
                 + 2 * h_pad * out_pad                    # final fc
                 + 10 * n_pad * n_pad)                    # softmax-ish VPU work
    cost = pl.CostEstimate(
        flops=int(flops),
        transcendentals=int(2 * B * n_pad * n_pad),
        bytes_accessed=int(x.size * F32 + adj_p.size * I8 + weight_bytes
                           + B * out_pad * F32))

    kernel = functools.partial(_critic_kernel, h_pad=h_pad)
    grid_spec = pltpu.PrefetchScalarGridSpec(
        num_scalar_prefetch=1,              # n_nodes -> SMEM
        grid=(B,),
        in_specs=[
            pl.BlockSpec((None, n_pad, in_pad), lambda b, nn: (b, 0, 0)),   # x
            pl.BlockSpec((None, n_pad, n_pad), lambda b, nn: (b, 0, 0)),    # adj
            pl.BlockSpec((in_pad, h_pad + 1), lambda b, nn: (0, 0)),        # waug1
            pl.BlockSpec((1, in_pad), lambda b, nn: (0, 0)),                # alw1
            pl.BlockSpec((1, h_pad), lambda b, nn: (0, 0)),                 # b1
            pl.BlockSpec((h_pad, h_pad + 1), lambda b, nn: (0, 0)),         # waug2
            pl.BlockSpec((1, h_pad), lambda b, nn: (0, 0)),                 # alw2
            pl.BlockSpec((1, h_pad), lambda b, nn: (0, 0)),                 # b2
            pl.BlockSpec((h_pad, out_pad), lambda b, nn: (0, 0)),           # wf
            pl.BlockSpec((1, out_pad), lambda b, nn: (0, 0)),               # bf
        ],
        out_specs=pl.BlockSpec((None, 1, out_pad), lambda b, nn: (b, 0, 0)),
    )
    out = pl.pallas_call(
        kernel,
        out_shape=jax.ShapeDtypeStruct((B, 1, out_pad), jnp.float32),
        grid_spec=grid_spec,
        compiler_params=pltpu.CompilerParams(
            dimension_semantics=("parallel",),        # graphs split across cores (v7x)
            vmem_limit_bytes=vmem_limit),
        cost_estimate=cost,
    )(n_nodes, x, adj_p, waug1, alw1, b1, waug2, alw2, b2, wf, bf)
    return out[:, 0, :out_dim]                         # (B, out_dim)


# ----------------------------- pure-JAX reference -----------------------------
def _gat_ref(h, w, al, ar, b, adj):
    feat = h @ w
    el = feat @ al[0]
    er = feat @ ar[0]
    e = er[:, None] + el[None, :]
    e = jnp.where(e > 0, e, NEG_SLOPE * e)
    e = jnp.where(adj > 0, e, -1e30)
    p = jnp.exp(e - e.max(-1, keepdims=True)) * (adj > 0)
    alpha = p / jnp.maximum(p.sum(-1, keepdims=True), 1e-30)
    return jnp.maximum(alpha @ feat + b, 0.0)


def _critic_ref(params, features, adj):
    h = _gat_ref(features, params["w1"], params["al1"], params["ar1"],
                 params["b1"], adj)
    h = _gat_ref(h, params["w2"], params["al2"], params["ar2"],
                 params["b2"], adj)
    hg = jnp.mean(h, axis=0, keepdims=True)
    return hg @ params["wf"] + params["bf"]


if __name__ == "__main__":
    IN_DIM, HIDDEN, OUT_DIM = 8, 32, 4
    B, N_MAX = 2, 12
    n_per_graph = [10, 7]   # distinct real node counts: exercises scalar prefetch + padding

    key = jax.random.PRNGKey(0)
    ks = jax.random.split(key, 12)
    scale = 0.1
    params = {
        "w1": scale * jax.random.normal(ks[0], (IN_DIM, HIDDEN), jnp.float32),
        "al1": scale * jax.random.normal(ks[1], (1, HIDDEN), jnp.float32),
        "ar1": scale * jax.random.normal(ks[2], (1, HIDDEN), jnp.float32),
        "b1": scale * jax.random.normal(ks[3], (1, HIDDEN), jnp.float32),
        "w2": scale * jax.random.normal(ks[4], (HIDDEN, HIDDEN), jnp.float32),
        "al2": scale * jax.random.normal(ks[5], (1, HIDDEN), jnp.float32),
        "ar2": scale * jax.random.normal(ks[6], (1, HIDDEN), jnp.float32),
        "b2": scale * jax.random.normal(ks[7], (1, HIDDEN), jnp.float32),
        "wf": scale * jax.random.normal(ks[8], (HIDDEN, OUT_DIM), jnp.float32),
        "bf": scale * jax.random.normal(ks[9], (1, OUT_DIM), jnp.float32),
    }

    feats = jax.random.normal(ks[10], (B, N_MAX, IN_DIM), jnp.float32)
    adj = jnp.zeros((B, N_MAX, N_MAX), jnp.float32)
    for b, nb in enumerate(n_per_graph):
        idx = jnp.arange(nb)
        adj = adj.at[b, idx, idx].set(1.0)                    # self-loops
        adj = adj.at[b, idx, (idx - 1) % nb].set(1.0)         # directed ring src=(dst-1)%nb
        feats = feats.at[b, nb:].set(0.0)                     # zero padded node rows
    adj = adj.at[0, 0, :].set(0.0)                            # graph 0, node 0: zero in-degree

    n_nodes = jnp.array(n_per_graph, jnp.int32)

    critic = jax.jit(critic_forward)

    # batched (dgl.batch / dgl.mean_nodes) path: (B, out_dim)
    out_b = jax.block_until_ready(critic(params, feats, adj, n_nodes))
    ref_b = jnp.stack([_critic_ref(params, feats[b, :nb], adj[b, :nb, :nb])[0]
                       for b, nb in enumerate(n_per_graph)])

    # single-graph (batch=False) path: (1, out_dim)
    n0 = n_per_graph[0]
    out_s = jax.block_until_ready(
        critic(params, feats[0, :n0], adj[0, :n0, :n0], jnp.array([n0], jnp.int32)))

    assert out_b.shape == (B, OUT_DIM), out_b.shape
    assert out_s.shape == (1, OUT_DIM), out_s.shape
    # bf16 MXU operands (f32 accumulation) vs the pure-f32 reference -> 1e-2 tolerance.
    assert jnp.allclose(out_b, ref_b, atol=1e-2, rtol=1e-2), (out_b, ref_b)
    assert jnp.allclose(out_s, ref_b[0:1], atol=1e-2, rtol=1e-2), (out_s, ref_b[0:1])
    print("KERNEL_OK")
</pallas_src>

<mosaic_0001>
module attributes {stable_mosaic.version = 11 : i64} {
  func.func @_critic_kernel(%arg0: i32, %arg1: memref<2xi32, #tpu.memory_space<smem>>, %arg2: memref<1x16x128xf32, #tpu.memory_space<vmem>>, %arg3: memref<1x16x16xi8, #tpu.memory_space<vmem>>, %arg4: memref<128x129xbf16, #tpu.memory_space<vmem>>, %arg5: memref<1x128xbf16, #tpu.memory_space<vmem>>, %arg6: memref<1x128xf32, #tpu.memory_space<vmem>>, %arg7: memref<128x129xbf16, #tpu.memory_space<vmem>>, %arg8: memref<1x128xbf16, #tpu.memory_space<vmem>>, %arg9: memref<1x128xf32, #tpu.memory_space<vmem>>, %arg10: memref<128x128xbf16, #tpu.memory_space<vmem>>, %arg11: memref<1x128xf32, #tpu.memory_space<vmem>>, %arg12: memref<1x1x128xf32, #tpu.memory_space<vmem>>) attributes {dimension_semantics = [#tpu.dimension_semantics<parallel>], iteration_bounds = array<i64: 2>, scalar_prefetch = 1 : i64, scratch_operands = 0 : i64, tpu.core_type = #tpu.core_type<tc>, window_params = [{transform_indices = @transform_0, window_bounds = array<i64: 1, 16, 128>}, {transform_indices = @transform_1, window_bounds = array<i64: 1, 16, 16>}, {pipeline_mode = #tpu.pipeline_mode<synchronous>, transform_indices = @transform_2, window_bounds = array<i64: 128, 129>}, {pipeline_mode = #tpu.pipeline_mode<synchronous>, transform_indices = @transform_3, window_bounds = array<i64: 1, 128>}, {pipeline_mode = #tpu.pipeline_mode<synchronous>, transform_indices = @transform_4, window_bounds = array<i64: 1, 128>}, {pipeline_mode = #tpu.pipeline_mode<synchronous>, transform_indices = @transform_5, window_bounds = array<i64: 128, 129>}, {pipeline_mode = #tpu.pipeline_mode<synchronous>, transform_indices = @transform_6, window_bounds = array<i64: 1, 128>}, {pipeline_mode = #tpu.pipeline_mode<synchronous>, transform_indices = @transform_7, window_bounds = array<i64: 1, 128>}, {pipeline_mode = #tpu.pipeline_mode<synchronous>, transform_indices = @transform_8, window_bounds = array<i64: 128, 128>}, {pipeline_mode = #tpu.pipeline_mode<synchronous>, transform_indices = @transform_9, window_bounds = array<i64: 1, 128>}, {transform_indices = @transform_10, window_bounds = array<i64: 1, 1, 128>}]} {
    %0 = arith.index_cast %arg0 : i32 to index
    %1 = memref.load %arg1[%0] : memref<2xi32, #tpu.memory_space<smem>>
    %c0 = arith.constant 0 : index
    %c0_0 = arith.constant 0 : index
    %c0_1 = arith.constant 0 : index
    %2 = vector.load %arg3[%c0, %c0_0, %c0_1] : memref<1x16x16xi8, #tpu.memory_space<vmem>>, vector<1x16x16xi8>
    %3 = vector.shape_cast %2 : vector<1x16x16xi8> to vector<16x16xi8>
    %4 = arith.sitofp %3 : vector<16x16xi8> to vector<16x16xf32>
    %cst = arith.constant 0.000000e+00 : f32
    %5 = vector.broadcast %cst : f32 to vector<16x16xf32>
    %6 = arith.cmpf ogt, %4, %5 : vector<16x16xf32>
    %c0_2 = arith.constant 0 : index
    %c0_3 = arith.constant 0 : index
    %c0_4 = arith.constant 0 : index
    %7 = vector.load %arg2[%c0_2, %c0_3, %c0_4] : memref<1x16x128xf32, #tpu.memory_space<vmem>>, vector<1x16x128xf32>
    %8 = vector.shape_cast %7 : vector<1x16x128xf32> to vector<16x128xf32>
    %9 = arith.truncf %8 : vector<16x128xf32> to vector<16x128xbf16>
    %c0_5 = arith.constant 0 : index
    %c0_6 = arith.constant 0 : index
    %10 = vector.load %arg4[%c0_5, %c0_6] : memref<128x129xbf16, #tpu.memory_space<vmem>>, vector<128x129xbf16>
    %cst_7 = arith.constant dense<0.000000e+00> : vector<16x129xf32>
    %11 = tpu.matmul %9, %10, %cst_7 {dimension_numbers = #tpu.dot_dimension_numbers<[1], [0], [0], [1], [0, 0, 1, 1], [], []>} : vector<16x128xbf16>, vector<128x129xbf16>, vector<16x129xf32> -> vector<16x129xf32>
    %12 = vector.extract_strided_slice %11 {offsets = [0, 0], sizes = [16, 128], strides = [1, 1]} : vector<16x129xf32> to vector<16x128xf32>
    %13 = vector.extract_strided_slice %11 {offsets = [0, 128], sizes = [16, 1], strides = [1, 1]} : vector<16x129xf32> to vector<16x1xf32>
    %c0_8 = arith.constant 0 : index
    %c0_9 = arith.constant 0 : index
    %14 = vector.load %arg5[%c0_8, %c0_9] : memref<1x128xbf16, #tpu.memory_space<vmem>>, vector<1x128xbf16>
    %cst_10 = arith.constant dense<0.000000e+00> : vector<1x16xf32>
    %15 = tpu.matmul %14, %9, %cst_10 {dimension_numbers = #tpu.dot_dimension_numbers<[1], [1], [0], [0], [0, 0, 1, 0], [], []>} : vector<1x128xbf16>, vector<16x128xbf16>, vector<1x16xf32> -> vector<1x16xf32>
    %16 = vector.broadcast %13 : vector<16x1xf32> to vector<16x16xf32>
    %17 = vector.broadcast %15 : vector<1x16xf32> to vector<16x16xf32>
    %18 = arith.addf %16, %17 : vector<16x16xf32>
    %cst_11 = arith.constant 0.000000e+00 : f32
    %19 = vector.broadcast %cst_11 : f32 to vector<16x16xf32>
    %20 = arith.cmpf ogt, %18, %19 : vector<16x16xf32>
    %cst_12 = arith.constant 2.000000e-01 : f32
    %21 = vector.broadcast %cst_12 : f32 to vector<16x16xf32>
    %22 = arith.mulf %21, %18 : vector<16x16xf32>
    %23 = arith.select %20, %18, %22 : vector<16x16xi1>, vector<16x16xf32>
    %cst_13 = arith.constant -1.000000e+30 : f32
    %24 = vector.broadcast %cst_13 : f32 to vector<16x16xf32>
    %25 = arith.select %6, %23, %24 : vector<16x16xi1>, vector<16x16xf32>
    %cst_14 = arith.constant dense<0xFF800000> : vector<16xf32>
    %26 = vector.multi_reduction <maximumf>, %25, %cst_14 [1] : vector<16x16xf32> to vector<16xf32>
    %27 = vector.shape_cast %26 : vector<16xf32> to vector<16x1xf32>
    %28 = vector.broadcast %27 : vector<16x1xf32> to vector<16x16xf32>
    %29 = arith.subf %25, %28 : vector<16x16xf32>
    %30 = math.exp %29 : vector<16x16xf32>
    %31 = arith.mulf %30, %4 : vector<16x16xf32>
    %cst_15 = arith.constant dense<0.000000e+00> : vector<16xf32>
    %32 = vector.multi_reduction <add>, %31, %cst_15 [1] : vector<16x16xf32> to vector<16xf32>
    %33 = vector.shape_cast %32 : vector<16xf32> to vector<16x1xf32>
    %34 = arith.truncf %31 : vector<16x16xf32> to vector<16x16xbf16>
    %35 = arith.truncf %12 : vector<16x128xf32> to vector<16x128xbf16>
    %cst_16 = arith.constant dense<0.000000e+00> : vector<16x128xf32>
    %36 = tpu.matmul %34, %35, %cst_16 {dimension_numbers = #tpu.dot_dimension_numbers<[1], [0], [0], [1], [0, 0, 1, 1], [], []>} : vector<16x16xbf16>, vector<16x128xbf16>, vector<16x128xf32> -> vector<16x128xf32>
    %cst_17 = arith.constant 1.000000e+00 : f32
    %37 = vector.broadcast %cst_17 : f32 to vector<16x1xf32>
    %38 = arith.maximumf %33, %37 : vector<16x1xf32>
    %39 = tpu.reciprocal %38 : vector<16x1xf32> -> vector<16x1xf32>
    %40 = vector.broadcast %39 : vector<16x1xf32> to vector<16x128xf32>
    %41 = arith.mulf %36, %40 : vector<16x128xf32>
    %c0_18 = arith.constant 0 : index
    %c0_19 = arith.constant 0 : index
    %42 = vector.load %arg6[%c0_18, %c0_19] : memref<1x128xf32, #tpu.memory_space<vmem>>, vector<1x128xf32>
    %43 = vector.broadcast %42 : vector<1x128xf32> to vector<16x128xf32>
    %44 = arith.addf %41, %43 : vector<16x128xf32>
    %cst_20 = arith.constant 0.000000e+00 : f32
    %45 = vector.broadcast %cst_20 : f32 to vector<16x128xf32>
    %46 = arith.maximumf %44, %45 : vector<16x128xf32>
    %47 = arith.truncf %46 : vector<16x128xf32> to vector<16x128xbf16>
    %c0_21 = arith.constant 0 : index
    %c0_22 = arith.constant 0 : index
    %48 = vector.load %arg7[%c0_21, %c0_22] : memref<128x129xbf16, #tpu.memory_space<vmem>>, vector<128x129xbf16>
    %cst_23 = arith.constant dense<0.000000e+00> : vector<16x129xf32>
    %49 = tpu.matmul %47, %48, %cst_23 {dimension_numbers = #tpu.dot_dimension_numbers<[1], [0], [0], [1], [0, 0, 1, 1], [], []>} : vector<16x128xbf16>, vector<128x129xbf16>, vector<16x129xf32> -> vector<16x129xf32>
    %50 = vector.extract_strided_slice %49 {offsets = [0, 0], sizes = [16, 128], strides = [1, 1]} : vector<16x129xf32> to vector<16x128xf32>
    %51 = vector.extract_strided_slice %49 {offsets = [0, 128], sizes = [16, 1], strides = [1, 1]} : vector<16x129xf32> to vector<16x1xf32>
    %c0_24 = arith.constant 0 : index
    %c0_25 = arith.constant 0 : index
    %52 = vector.load %arg8[%c0_24, %c0_25] : memref<1x128xbf16, #tpu.memory_space<vmem>>, vector<1x128xbf16>
    %cst_26 = arith.constant dense<0.000000e+00> : vector<1x16xf32>
    %53 = tpu.matmul %52, %47, %cst_26 {dimension_numbers = #tpu.dot_dimension_numbers<[1], [1], [0], [0], [0, 0, 1, 0], [], []>} : vector<1x128xbf16>, vector<16x128xbf16>, vector<1x16xf32> -> vector<1x16xf32>
    %54 = vector.broadcast %51 : vector<16x1xf32> to vector<16x16xf32>
    %55 = vector.broadcast %53 : vector<1x16xf32> to vector<16x16xf32>
    %56 = arith.addf %54, %55 : vector<16x16xf32>
    %cst_27 = arith.constant 0.000000e+00 : f32
    %57 = vector.broadcast %cst_27 : f32 to vector<16x16xf32>
    %58 = arith.cmpf ogt, %56, %57 : vector<16x16xf32>
    %cst_28 = arith.constant 2.000000e-01 : f32
    %59 = vector.broadcast %cst_28 : f32 to vector<16x16xf32>
    %60 = arith.mulf %59, %56 : vector<16x16xf32>
    %61 = arith.select %58, %56, %60 : vector<16x16xi1>, vector<16x16xf32>
    %cst_29 = arith.constant -1.000000e+30 : f32
    %62 = vector.broadcast %cst_29 : f32 to vector<16x16xf32>
    %63 = arith.select %6, %61, %62 : vector<16x16xi1>, vector<16x16xf32>
    %cst_30 = arith.constant dense<0xFF800000> : vector<16xf32>
    %64 = vector.multi_reduction <maximumf>, %63, %cst_30 [1] : vector<16x16xf32> to vector<16xf32>
    %65 = vector.shape_cast %64 : vector<16xf32> to vector<16x1xf32>
    %66 = vector.broadcast %65 : vector<16x1xf32> to vector<16x16xf32>
    %67 = arith.subf %63, %66 : vector<16x16xf32>
    %68 = math.exp %67 : vector<16x16xf32>
    %69 = arith.mulf %68, %4 : vector<16x16xf32>
    %cst_31 = arith.constant dense<0.000000e+00> : vector<16xf32>
    %70 = vector.multi_reduction <add>, %69, %cst_31 [1] : vector<16x16xf32> to vector<16xf32>
    %71 = vector.shape_cast %70 : vector<16xf32> to vector<16x1xf32>
    %72 = arith.truncf %69 : vector<16x16xf32> to vector<16x16xbf16>
    %73 = arith.truncf %50 : vector<16x128xf32> to vector<16x128xbf16>
    %cst_32 = arith.constant dense<0.000000e+00> : vector<16x128xf32>
    %74 = tpu.matmul %72, %73, %cst_32 {dimension_numbers = #tpu.dot_dimension_numbers<[1], [0], [0], [1], [0, 0, 1, 1], [], []>} : vector<16x16xbf16>, vector<16x128xbf16>, vector<16x128xf32> -> vector<16x128xf32>
    %cst_33 = arith.constant 1.000000e+00 : f32
    %75 = vector.broadcast %cst_33 : f32 to vector<16x1xf32>
    %76 = arith.maximumf %71, %75 : vector<16x1xf32>
    %77 = tpu.reciprocal %76 : vector<16x1xf32> -> vector<16x1xf32>
    %78 = vector.broadcast %77 : vector<16x1xf32> to vector<16x128xf32>
    %79 = arith.mulf %74, %78 : vector<16x128xf32>
    %c0_34 = arith.constant 0 : index
    %c0_35 = arith.constant 0 : index
    %80 = vector.load %arg9[%c0_34, %c0_35] : memref<1x128xf32, #tpu.memory_space<vmem>>, vector<1x128xf32>
    %81 = vector.broadcast %80 : vector<1x128xf32> to vector<16x128xf32>
    %82 = arith.addf %79, %81 : vector<16x128xf32>
    %cst_36 = arith.constant 0.000000e+00 : f32
    %83 = vector.broadcast %cst_36 : f32 to vector<16x128xf32>
    %84 = arith.maximumf %82, %83 : vector<16x128xf32>
    %85 = tpu.iota {dimensions = array<i32: 0>} : vector<16x128xi32>
    %86 = vector.broadcast %1 : i32 to vector<16x128xi32>
    %87 = arith.cmpi slt, %85, %86 : vector<16x128xi32>
    %88 = arith.extui %87 : vector<16x128xi1> to vector<16x128xi32>
    %89 = arith.sitofp %88 : vector<16x128xi32> to vector<16x128xf32>
    %cst_37 = arith.constant dense<0.000000e+00> : vector<128xf32>
    %90 = vector.multi_reduction <add>, %89, %cst_37 [0] : vector<16x128xf32> to vector<128xf32>
    %91 = vector.shape_cast %90 : vector<128xf32> to vector<1x128xf32>
    %92 = arith.mulf %84, %89 : vector<16x128xf32>
    %cst_38 = arith.constant dense<0.000000e+00> : vector<128xf32>
    %93 = vector.multi_reduction <add>, %92, %cst_38 [0] : vector<16x128xf32> to vector<128xf32>
    %94 = vector.shape_cast %93 : vector<128xf32> to vector<1x128xf32>
    %95 = tpu.reciprocal %91 : vector<1x128xf32> -> vector<1x128xf32>
    %96 = arith.mulf %94, %95 : vector<1x128xf32>
    %97 = arith.truncf %96 : vector<1x128xf32> to vector<1x128xbf16>
    %c0_39 = arith.constant 0 : index
    %c0_40 = arith.constant 0 : index
    %98 = vector.load %arg10[%c0_39, %c0_40] : memref<128x128xbf16, #tpu.memory_space<vmem>>, vector<128x128xbf16>
    %cst_41 = arith.constant dense<0.000000e+00> : vector<1x128xf32>
    %99 = tpu.matmul %97, %98, %cst_41 {dimension_numbers = #tpu.dot_dimension_numbers<[1], [0], [0], [1], [0, 0, 1, 1], [], []>} : vector<1x128xbf16>, vector<128x128xbf16>, vector<1x128xf32> -> vector<1x128xf32>
    %c0_42 = arith.constant 0 : index
    %c0_43 = arith.constant 0 : index
    %100 = vector.load %arg11[%c0_42, %c0_43] : memref<1x128xf32, #tpu.memory_space<vmem>>, vector<1x128xf32>
    %101 = arith.addf %99, %100 : vector<1x128xf32>
    %c0_44 = arith.constant 0 : index
    %c0_45 = arith.constant 0 : index
    %c0_46 = arith.constant 0 : index
    %102 = vector.load %arg12[%c0_44, %c0_45, %c0_46] : memref<1x1x128xf32, #tpu.memory_space<vmem>>, vector<1x1x128xf32>
    %103 = vector.shape_cast %102 : vector<1x1x128xf32> to vector<1x128xf32>
    %104 = vector.shape_cast %101 : vector<1x128xf32> to vector<1x1x128xf32>
    tpu.vector_store %arg12[%c0_44, %c0_45, %c0_46], %104 {strides = array<i32>} : memref<1x1x128xf32, #tpu.memory_space<vmem>>, vector<1x1x128xf32>,
    return
  }
  func.func @transform_0(%arg0: i32, %arg1: memref<2xi32, #tpu.memory_space<smem>>) -> (i32, i32, i32) {
    %c0_i32 = arith.constant 0 : i32
    %c0_i32_0 = arith.constant 0 : i32
    %c0_i32_1 = arith.constant 0 : i32
    return %arg0, %c0_i32, %c0_i32_0 : i32, i32, i32
  }
  func.func @transform_1(%arg0: i32, %arg1: memref<2xi32, #tpu.memory_space<smem>>) -> (i32, i32, i32) {
    %c0_i32 = arith.constant 0 : i32
    %c0_i32_0 = arith.constant 0 : i32
    %c0_i32_1 = arith.constant 0 : i32
    return %arg0, %c0_i32, %c0_i32_0 : i32, i32, i32
  }
  func.func @transform_2(%arg0: i32, %arg1: memref<2xi32, #tpu.memory_space<smem>>) -> (i32, i32) {
    %c0_i32 = arith.constant 0 : i32
    %c0_i32_0 = arith.constant 0 : i32
    %c0_i32_1 = arith.constant 0 : i32
    return %c0_i32, %c0_i32_0 : i32, i32
  }
  func.func @transform_3(%arg0: i32, %arg1: memref<2xi32, #tpu.memory_space<smem>>) -> (i32, i32) {
    %c0_i32 = arith.constant 0 : i32
    %c0_i32_0 = arith.constant 0 : i32
    %c0_i32_1 = arith.constant 0 : i32
    return %c0_i32, %c0_i32_0 : i32, i32
  }
  func.func @transform_4(%arg0: i32, %arg1: memref<2xi32, #tpu.memory_space<smem>>) -> (i32, i32) {
    %c0_i32 = arith.constant 0 : i32
    %c0_i32_0 = arith.constant 0 : i32
    %c0_i32_1 = arith.constant 0 : i32
    return %c0_i32, %c0_i32_0 : i32, i32
  }
  func.func @transform_5(%arg0: i32, %arg1: memref<2xi32, #tpu.memory_space<smem>>) -> (i32, i32) {
    %c0_i32 = arith.constant 0 : i32
    %c0_i32_0 = arith.constant 0 : i32
    %c0_i32_1 = arith.constant 0 : i32
    return %c0_i32, %c0_i32_0 : i32, i32
  }
  func.func @transform_6(%arg0: i32, %arg1: memref<2xi32, #tpu.memory_space<smem>>) -> (i32, i32) {
    %c0_i32 = arith.constant 0 : i32
    %c0_i32_0 = arith.constant 0 : i32
    %c0_i32_1 = arith.constant 0 : i32
    return %c0_i32, %c0_i32_0 : i32, i32
  }
  func.func @transform_7(%arg0: i32, %arg1: memref<2xi32, #tpu.memory_space<smem>>) -> (i32, i32) {
    %c0_i32 = arith.constant 0 : i32
    %c0_i32_0 = arith.constant 0 : i32
    %c0_i32_1 = arith.constant 0 : i32
    return %c0_i32, %c0_i32_0 : i32, i32
  }
  func.func @transform_8(%arg0: i32, %arg1: memref<2xi32, #tpu.memory_space<smem>>) -> (i32, i32) {
    %c0_i32 = arith.constant 0 : i32
    %c0_i32_0 = arith.constant 0 : i32
    %c0_i32_1 = arith.constant 0 : i32
    return %c0_i32, %c0_i32_0 : i32, i32
  }
  func.func @transform_9(%arg0: i32, %arg1: memref<2xi32, #tpu.memory_space<smem>>) -> (i32, i32) {
    %c0_i32 = arith.constant 0 : i32
    %c0_i32_0 = arith.constant 0 : i32
    %c0_i32_1 = arith.constant 0 : i32
    return %c0_i32, %c0_i32_0 : i32, i32
  }
  func.func @transform_10(%arg0: i32, %arg1: memref<2xi32, #tpu.memory_space<smem>>) -> (i32, i32, i32) {
    %c0_i32 = arith.constant 0 : i32
    %c0_i32_0 = arith.constant 0 : i32
    %c0_i32_1 = arith.constant 0 : i32
    return %arg0, %c0_i32, %c0_i32_0 : i32, i32, i32
  }
}

</mosaic_0001>

<bundles_post_ra>
// kernel: critic_forward.1
= control target key start
LH: loop header
LB: loop body
LE: loop exit
PB: predicated region body
PF: predicated region fallthrough
CT: control target
= control target key end

     0   :  { %s1882_s0 = inlined_call_operand.vmem [shape: s32[2], index: 0, kind: input, shape index: {}]   ;;  %s1883_s1 = inlined_call_operand.vmem [shape: f32[2,16,128], index: 1, kind: input, shape index: {}]   ;;  %s1884_s2 = inlined_call_operand.vmem [shape: s8[2,16,16], index: 2, kind: input, shape index: {}]   ;;  %s1885_s3 = inlined_call_operand.vmem [shape: bf16[128,129], index: 3, kind: input, shape index: {}]   ;;  %s1886_s4 = inlined_call_operand.vmem [shape: bf16[1,128], index: 4, kind: input, shape index: {}]   ;;  %s1887_s5 = inlined_call_operand.vmem [shape: f32[1,128], index: 5, kind: input, shape index: {}]   ;;  %s1888_s6 = inlined_call_operand.vmem [shape: bf16[128,129], index: 6, kind: input, shape index: {}]   ;;  %s1889_s7 = inlined_call_operand.vmem [shape: bf16[1,128], index: 7, kind: input, shape index: {}]   ;;  %s1890_s8 = inlined_call_operand.vmem [shape: f32[1,128], index: 8, kind: input, shape index: {}]   ;;  %s1891_s9 = inlined_call_operand.vmem [shape: bf16[128,128], index: 9, kind: input, shape index: {}]   ;;  %s1892_s10 = inlined_call_operand.vmem [shape: f32[1,128], index: 10, kind: input, shape index: {}]   ;;  %s1893_s11 = inlined_call_operand.hbm [shape: f32[2,1,128], index: 11, kind: output, shape index: {}]  }
   0x1   :  { %s16_s19 = sshll.u32 %s1882_s0, 4  ;;  %s17_s19 = int_to_ptr.vmem [resolvable:$true] %s16_s19 }
   0x2   :  { %s1431_s20 = scalar_lea.vmem %s17_s19, 16  ;;  %p1436_p1 = scmp.lt.s32.totalorder %s17_s19, %s17_s19 }
   0x3   :  { %p1432_p0 = scmp.ne.s32.totalorder %s17_s19, %s1431_s20  ;;  %p1437_p2 = scmp.lt.s32.totalorder %s1431_s20, %s1431_s20 }
   0x5   :  { %p1438_p3 = por %p1437_p2, %p1436_p1 }
   0x7   :  { %p1439_p4 = pnand %p1438_p3, %p1432_p0 }
   0x9   :  { %1442 = shalt.err (!%p1439_p4)  }
   0xa   :  { %s1507_s21 = smov [#allocation3]  }
   0xb   :  { %19 = dma.vmem_to_smem %s17_s19, 16, %s1507_s21, [#allocation2] }
   0xc   :  { %1485 = dma.done.wait [#allocation2], 16 }
   0xd   :  { %1486 = vsyncadd [#allocation2], 4294967280 }
   0xe   :  { %21 = sfence }
   0xf   :  { %22 = vsyncpa [#allocation5], 0 }
  0x10   :  { %24 = vsyncpa [#allocation5 + $0x1], 0  ;;  %s1575_s22 = smov 0   ;;  %s1577_s23 = smov 0  }
  0x11   :  { %s1579_s0 = smov 0   ;;  %s1581_s24 = smov 0  }
  0x12 LB: > { %1895 = sst [smem:[#allocation8_spill]] %s1501_s0  ;;  %s1596_s25 = sadd.s32 4294967295, %s1505_s24   ;;  %s1505_s24 = sphi %s1581_s24, %s1903_s24   ;;  %s1501_s0 = sphi %s1579_s0, %s1900_s0   ;;  %s1497_s23 = sphi %s1577_s23, %s1902_s23   ;;  %s1493_s22 = sphi %s1575_s22, %s1901_s22  }
  0x13   : > { %s1188_s26 = sadd.s32 4294967294, %s1505_s24   ;;  %s1600_s27 = sadd.s32 1, %s1505_s24  }
  0x14   : > { %s257_s28 = sadd.s32 1, %s1501_s0  ;;  %s254_s29 = ssub.s32 %s1505_s24, %s1600_s27 }
  0x15   : > { %p267_p5 = scmp.ne.s32.totalorder %s1501_s0, %s1497_s23  ;;  %p255_p6 = scmp.eq.s32.totalorder %s254_s29, 0 }
  0x16   : > { %p268_p7 = scmp.eq.s32.totalorder %s1596_s25, 1  ;;  %p273_p8 = scmp.ne.s32.totalorder %s1497_s23, %s1493_s22 }
  0x17   : > { %p274_p9 = scmp.eq.s32.totalorder %s1188_s26, 1  ;;  %p1191_p12 = scmp.ge.s32.totalorder %s1505_s24, 1 }
  0x18   : > { %s1611_s30 = scalar_select %p255_p6, %s1501_s0, %s257_s28  }
  0x19   : > { %p1613_p10 = por %p268_p7, %p267_p5  ;;  %p1617_p11 = por %p274_p9, %p273_p8 }
  0x1a   : > { %1896 = sst [smem:[#allocation9_spill]] %s1611_s30  ;;  %p332_p13 = scmp.lt.s32.totalorder %s1505_s24, 3 }
  0x1c   : > { %p333_p0 = pnand %p1191_p12, %p332_p13 }
  0x1d   : > { %p374_p1 = scmp.lt.s32.totalorder (!%p333_p0), %s1596_s25, 1  ;;  %s372_s28 = sand.u32 (!%p333_p0), 1, %s1497_s23  }
  0x1e   : > { %336 = sbr.rel (%p333_p0) target bundleno = 1686 (0x696), region = 60  ;;  %s373_s16 = scalar_lea.vmem (!%p333_p0), [#allocation4], %s372_s28 }
  0x1f   : > { %s1121_s17 = sshll.u32 (!%p333_p0), %s373_s16, 4  ;;  %s1843_s17 = int_to_ptr.vmem [resolvable:$true] %s1121_s17 }
  0x23   : > { %v1357_v0 = vld [vmem:[%s1885_s3 + $0x74] ss:$8 sps:$4 sm:$0xff]   ;;  %v1359_v1 = vld [vmem:[%s1885_s3 + $0x70] ss:$8 sps:$4 sm:$0xff]   ;;  %v1508_v2 = vmov 0   ;;  %s1636_s20 = scalar_select %p374_p1, %s1596_s25, 1  ;;  %v587_v31 = vlaneseq }
  0x24   : > { %525 = vmatprep.mubr.bf16.mxu0 %v1508_v2  ;;  %1355 = vset.pattern.permute.xlu0 %v1508_v2  ;;  %v1360_v3 = vld [vmem:[%s1885_s3 + $0x64] ss:$8 sps:$4 sm:$0xff]   ;;  %v1509_v4 = vmov 0.0   ;;  %v1362_v5 = vld [vmem:[%s1885_s3 + $0x60] ss:$8 sps:$4 sm:$0xff]   ;;  %vm1510_vm0 = vmmov 0  }
  0x25   : > { %493 = vmatprep.subr.bf16.mxu0 %v1357_v0  ;;  %1268 = vmatprep.subr.bf16.mxu1 %v1509_v4  ;;  %v1363_v6 = vld [vmem:[%s1885_s3 + $0x54] ss:$8 sps:$4 sm:$0xff]   ;;  %s1245_s14 = sshll.u32 %s1636_s20, 4  ;;  %v1365_v7 = vld [vmem:[%s1885_s3 + $0x50] ss:$8 sps:$4 sm:$0xff]   ;;  %s1246_s30 = sshll.u32 %s1636_s20, 2 }
  0x26   : > { %494 = vmatpush1.bf16.msra.mxu0 %v1359_v1  ;;  %1270 = vmatprep.mubr.msk.bf16.mxu1 %vm1510_vm0, %v1509_v4  ;;  %s378_s19 = scalar_lea.vmem %s1883_s1, %s1245_s14  ;;  %v1366_v8 = vld [vmem:[%s1885_s3 + $0x44] ss:$8 sps:$4 sm:$0xff]   ;;  %v1368_v9 = vld [vmem:[%s1885_s3 + $0x40] ss:$8 sps:$4 sm:$0xff]   ;;  %v1369_v11 = vld [vmem:[%s1885_s3 + $0x34] ss:$8 sps:$4 sm:$0xff]  }
  0x27   : > { %495 = vmatprep.subr.bf16.mxu0 %v1360_v3  ;;  %1356 = vset.pattern.permute.xlu1 %v1508_v2  ;;  %v394_v10 = vld [vmem:[%s378_s19] sm:$0xff]  ;;  %v395_v12 = vld [vmem:[%s378_s19 + $0x8] sm:$0xff]  ;;  %v1371_v14 = vld [vmem:[%s1885_s3 + $0x30] ss:$8 sps:$4 sm:$0xff]   ;;  %v1695_v32 = vshrl.u32 %v587_v31, 7  ;;  %s383_s19 = scalar_lea.vmem %s1884_s2, %s1246_s30  ;;  %vm601_vm3 = vcmask 130048  }
  0x28   : > { %v396_v13 = vpack.c.bf16 %v395_v12, %v394_v10  ;;  %v1372_v15 = vld [vmem:[%s1885_s3 + $0x24] ss:$8 sps:$4 sm:$0xff]   ;;  %v536_v16 = vld [vmem:[%s1886_s4] sm:$0x1]  ;;  %v1375_v18 = vld [vmem:[%s1885_s3 + $0x14] ss:$8 sps:$4 sm:$0xff]  }
  0x29   : > { %v1374_v17 = vld [vmem:[%s1885_s3 + $0x20] ss:$8 sps:$4 sm:$0xff]   ;;  %v1377_v19 = vld [vmem:[%s1885_s3 + $0x10] ss:$8 sps:$4 sm:$0xff]   ;;  %v1378_v20 = vld [vmem:[%s1885_s3 + $0x4] ss:$8 sps:$4 sm:$0xff]  }
  0x2a   : > { %496 = vmatpush1.bf16.msra.mxu0 %v1362_v5  ;;  %1269 = vmatpush3.bf16.xpose.msra.mxu1 %v396_v13  ;;  %v1380_v21 = vld [vmem:[%s1885_s3] ss:$8 sps:$4 sm:$0xff]   ;;  %v589_v34 = vsub.s32 0, %v1695_v32  ;;  %v1381_v1 = vld [vmem:[%s1888_s6 + $0x70] ss:$8 sps:$4 sm:$0xff]   ;;  %s385_s20 = sld [smem:[#allocation3 + %s1596_s25]] }
  0x2b   : > { %497 = vmatprep.subr.bf16.mxu0 %v1363_v6  ;;  %1274 = vmatprep.subr.bf16.mxu1 %v1509_v4  ;;  %v1248_v33 = vld [vmem:[%s383_s19] sm:$0xf]   ;;  %v1383_v3 = vld [vmem:[%s1888_s6 + $0x74] ss:$8 sps:$4 sm:$0xff]   ;;  %v1386_v5 = vld [vmem:[%s1888_s6 + $0x64] ss:$8 sps:$4 sm:$0xff]  }
  0x2c   : > { %v1249_v35 = vunpack.c.0.s8 %v1248_v33  ;;  %v1250_v38 = vunpack.c.1.s8 %v1248_v33  ;;  %v1384_v6 = vld [vmem:[%s1888_s6 + $0x60] ss:$8 sps:$4 sm:$0xff]   ;;  %v1395_v10 = vld [vmem:[%s1888_s6 + $0x34] ss:$8 sps:$4 sm:$0xff]   ;;  %v1398_v12 = vld [vmem:[%s1888_s6 + $0x24] ss:$8 sps:$4 sm:$0xff]  }
  0x2d   : > { %s1242_s14 = sshll.u32 %s1596_s25, 4  ;;  %s1109_s19 = scalar_lea.sflag [#allocation5], %s372_s28 }
  0x2e   : > { %498 = vmatpush1.bf16.msra.mxu0 %v1365_v7  ;;  %v1703_v37 = vcvt.s32.f32 %v1249_v35  ;;  %v1706_v42 = vcvt.s32.f32 %v1250_v38  ;;  %v1387_v7 = vld [vmem:[%s1888_s6 + $0x50] ss:$8 sps:$4 sm:$0xff]   ;;  %s1841_s0 = scalar_lea.hbm %s1893_s11, %s1242_s14  ;;  %s1511_s25 = smov [#allocation4]  }
  0x2f   : > { %499 = vmatprep.subr.bf16.mxu0 %v1366_v8  ;;  %v1392_v8 = vld [vmem:[%s1888_s6 + $0x44] ss:$8 sps:$4 sm:$0xff]   ;;  %s1447_s21 = sshll.u32 %s1511_s25, 4  ;;  %s1448_s21 = int_to_ptr.vmem [resolvable:$false] %s1447_s21 }
  0x30   : > { %vm392_vm1 = vcmp.gt.f32.partialorder %v1703_v37, 0.0  ;;  %vm393_vm4 = vcmp.gt.f32.partialorder %v1706_v42, 0.0  ;;  %s1449_s26 = scalar_lea.vmem %s1448_s21, 32  ;;  %p1450_p5 = scmp.lt.s32.totalorder %s1843_s17, %s1448_s21 }
  0x31   : > { %1271 = vmatmul.mubr.bf16.vlgmr.msra.gmra.mxu1 %v536_v16  ;;  %v1404_v16 = vld [vmem:[%s1888_s6 + $0x4] ss:$8 sps:$4 sm:$0xff]  }
  0x32   : > { %500 = vmatpush1.bf16.msra.mxu0 %v1368_v9  ;;  %1276 = vmatprep.mubr.msk.bf16.mxu1 %vm1510_vm0, %v1509_v4  ;;  %v1390_v9 = vld [vmem:[%s1888_s6 + $0x40] ss:$8 sps:$4 sm:$0xff]  }
  0x33   : > { %501 = vmatprep.subr.bf16.mxu0 %v1369_v11  ;;  %v1393_v11 = vld [vmem:[%s1888_s6 + $0x30] ss:$8 sps:$4 sm:$0xff]  }
  0x36   : > { %502 = vmatpush1.bf16.msra.mxu0 %v1371_v14  ;;  %v1401_v14 = vld [vmem:[%s1888_s6 + $0x14] ss:$8 sps:$4 sm:$0xff]  }
  0x37   : > { %503 = vmatprep.subr.bf16.mxu0 %v1372_v15  ;;  %v1399_v15 = vld [vmem:[%s1888_s6 + $0x10] ss:$8 sps:$4 sm:$0xff]  }
  0x3a   : > { %504 = vmatpush1.bf16.msra.mxu0 %v1374_v17  ;;  %v1402_v17 = vld [vmem:[%s1888_s6] ss:$8 sps:$4 sm:$0xff]  }
  0x3b   : > { %505 = vmatprep.subr.bf16.mxu0 %v1375_v18 }
  0x3e   : > { %506 = vmatpush1.bf16.msra.mxu0 %v1377_v19 }
  0x3f   : > { %507 = vmatprep.subr.bf16.mxu0 %v1378_v20 }
  0x42   : > { %508 = vmatpush1.bf16.msra.mxu0 %v1380_v21 }
  0x43   : > { %1292 = vmatprep.subr.bf16.mxu0 %v1509_v4 }
  0x45   : > { %526 = vmatmul.mubr.bf16.vlgmr.msra.gmra.mxu0 %v396_v13  ;;  %v1396_v13 = vld [vmem:[%s1888_s6 + $0x20] ss:$8 sps:$4 sm:$0xff]  }
  0x46   : > { %1308 = vmatprep.mubr.msk.bf16.mxu0 %vm1510_vm0, %v1509_v4 }
  0xf1   : > { %v571_v22 = vpop.f32.mrf.mxu1 }
  0xf2   : > { %v590_v36 = vrot.slane %v571_v22, %v589_v34 }
  0xf3   : > { %v1272_v23 = vpop.f32.mrf.mxu1 }
  0xf5   : > { %v574_v24 = vpop.f32.mrf.mxu1 }
  0xf7   : > { %v1273_v25 = vpop.f32.mrf.mxu1 }
  0xf8   : > { %v1213_v25 = vld [vmem:[%s1887_s5] ss:$0 sm:$0xff] }
 0x105   : > { %v527_v26 = vpop.f32.mrf.mxu0 }
 0x107   : > { %v529_v27 = vpop.f32.mrf.mxu0 }
 0x108   : > { %579 = vperm.xlu0 %1355, %v529_v27  }
 0x109   : > { %v531_v28 = vpop.f32.mrf.mxu0 }
 0x10a   : > { %v623_v29 = vpack.c.bf16 %v531_v28, %v527_v26 }
 0x10b   : > { %v533_v30 = vpop.f32.mrf.mxu0 }
 0x10c   : > { %1275 = vmatpush3.bf16.msra.mxu1 %v623_v29  ;;  %584 = vperm.xlu0 %1355, %v533_v30  }
 0x10d   : > { %782 = vmatprep.subr.bf16.mxu1 %v1383_v3 }
 0x183   : > { %v580_v39 = vpop.permute.xlu0 %579 }
 0x184   : > { %v591_v40 = vadd.f32 %v590_v36, %v580_v39  ;;  %v825_v39 = vld [vmem:[%s1889_s7] sm:$0x1] }
 0x186   : > { %v595_v41 = vmul.f32 0.2, %v591_v40  ;;  %vm593_vm2 = vcmp.gt.f32.partialorder %v591_v40, 0.0 }
 0x187   : > { %v585_v43 = vpop.permute.xlu0 %584 }
 0x188   : > { %v592_v44 = vadd.f32 %v590_v36, %v585_v43  ;;  %v597_v45 = vsel %vm593_vm2, %v591_v40, %v595_v41 }
 0x189   : > { %v599_v46 = vsel %vm392_vm1, %v597_v45, -1e+30 }
 0x18a   : > { %v596_v47 = vmul.f32 0.2, %v592_v44  ;;  %v602_v48 = vsel %vm601_vm3, %v599_v46, -inf  ;;  %vm594_vm5 = vcmp.gt.f32.partialorder %v592_v44, 0.0 }
 0x18b   : > { %603 = vmax.xlane.f32.xlu1 %v602_v48 }
 0x18c   : > { %v598_v49 = vsel %vm594_vm5, %v592_v44, %v596_v47 }
 0x18d   : > { %v600_v50 = vsel %vm393_vm4, %v598_v49, -1e+30 }
 0x18e   : > { %v605_v51 = vsel %vm601_vm3, %v600_v50, -inf }
 0x18f   : > { %606 = vmax.xlane.f32.xlu1 %v605_v51 }
 0x214   : > { %v604_v52 = vpop.xlane.xlu1 %603 }
 0x215   : > { %v608_v53 = vsub.f32 %v599_v46, %v604_v52 }
 0x217   : > { %v610_v54 = vmul.f32 1.442695, %v608_v53 }
 0x218   : > { %v607_v55 = vpop.xlane.xlu1 %606 }
 0x219   : > { %1413 = vpow2.f32 %v610_v54  ;;  %v609_v56 = vsub.f32 %v600_v50, %v607_v55 }
 0x21b   : > { %v612_v57 = vmul.f32 1.442695, %v609_v56 }
 0x21d   : > { %1415 = vpow2.f32 %v612_v57 }
 0x226   : > { %v1414_v58 = vpop.eup %1413 }
 0x227   : > { %v614_v59 = vmul.f32 %v1414_v58, %v1703_v37 }
 0x229   : > { %v616_v60 = vsel %vm601_vm3, %v614_v59, 0.0 }
 0x22a   : > { %v1416_v61 = vpop.eup %1415  ;;  %617 = vadd.xlane.f32.xlu0 %v616_v60 }
 0x22b   : > { %v615_v62 = vmul.f32 %v1416_v61, %v1706_v42 }
 0x22d   : > { %v619_v63 = vsel %vm601_vm3, %v615_v62, 0.0  ;;  %v622_v0 = vpack.c.bf16 %v615_v62, %v614_v59 }
 0x22e   : > { %620 = vadd.xlane.f32.xlu1 %v619_v63 }
 0x22f   : > { %1277 = vmatmul.mubr.msk.bf16.vlgmr.msra.gmra.mxu1 %vm601_vm3, %v622_v0 }
 0x230   : > { %814 = vmatprep.mubr.bf16.mxu1 %v1508_v2  ;;  %783 = vmatpush1.bf16.msra.mxu1 %v1381_v1  ;;  %v1389_v2 = vld [vmem:[%s1888_s6 + $0x54] ss:$8 sps:$4 sm:$0xff]  }
 0x231   : > { %784 = vmatprep.subr.bf16.mxu1 %v1386_v5 }
 0x234   : > { %785 = vmatpush1.bf16.msra.mxu1 %v1384_v6 }
 0x235   : > { %786 = vmatprep.subr.bf16.mxu1 %v1389_v2 }
 0x238   : > { %787 = vmatpush1.bf16.msra.mxu1 %v1387_v7 }
 0x239   : > { %788 = vmatprep.subr.bf16.mxu1 %v1392_v8 }
 0x23c   : > { %789 = vmatpush1.bf16.msra.mxu1 %v1390_v9 }
 0x23d   : > { %790 = vmatprep.subr.bf16.mxu1 %v1395_v10 }
 0x240   : > { %791 = vmatpush1.bf16.msra.mxu1 %v1393_v11 }
 0x241   : > { %792 = vmatprep.subr.bf16.mxu1 %v1398_v12  ;;  %v1405_v12 = vld [vmem:[%s1891_s9 + $0x38] sm:$0xff]  }
 0x242   : > { %1293 = vmatpush3.bf16.msra.mxu0 %v1405_v12 }
 0x243   : > { %1294 = vmatprep.subr.bf16.mxu0 %v1509_v4 }
 0x244   : > { %793 = vmatpush1.bf16.msra.mxu1 %v1396_v13  ;;  %v1408_v13 = vld [vmem:[%s1891_s9 + $0x20] sm:$0xff]  }
 0x245   : > { %794 = vmatprep.subr.bf16.mxu1 %v1401_v14  ;;  %v1409_v14 = vld [vmem:[%s1891_s9 + $0x18] sm:$0xff]  }
 0x248   : > { %795 = vmatpush1.bf16.msra.mxu1 %v1399_v15  ;;  %v1410_v15 = vld [vmem:[%s1891_s9 + $0x10] sm:$0xff]  }
 0x249   : > { %796 = vmatprep.subr.bf16.mxu1 %v1404_v16  ;;  %v1411_v16 = vld [vmem:[%s1891_s9 + $0x8] sm:$0xff]  }
 0x24c   : > { %797 = vmatpush1.bf16.msra.mxu1 %v1402_v17  ;;  %v1412_v17 = vld [vmem:[%s1891_s9] sm:$0xff]  }
 0x24d   : > { %1280 = vmatprep.subr.bf16.mxu1 %v1509_v4 }
 0x2b3   : > { %v618_v18 = vpop.xlane.xlu0 %617 }
 0x2b4   : > { %v668_v19 = vmax.f32 %v618_v18, 1.0  ;;  %v975_v18 = vadd.s32 8, %v1695_v32 }
 0x2b6   : > { %1417 = vrcp.f32 %v668_v19  ;;  %v976_v19 = vstv %s385_s20  ;;  %s1443_s20 = scalar_lea.vmem %s1843_s17, 16 }
 0x2b7   : > { %v621_v20 = vpop.xlane.xlu1 %620  ;;  %vm977_vm8 = vcmp.lt.s32.totalorder %v1695_v32, %v976_v19  ;;  %vm978_vm9 = vcmp.lt.s32.totalorder %v975_v18, %v976_v19  ;;  %v1231_v32 = vld [vmem:[%s1890_s8] ss:$0 sm:$0xff]  ;;  %p1444_p2 = scmp.ne.s32.totalorder %s1843_s17, %s1443_s20  ;;  %p1451_p6 = scmp.lt.s32.totalorder %s1449_s26, %s1443_s20 }
 0x2b8   : > { %v669_v21 = vmax.f32 %v621_v20, 1.0 }
 0x2b9   : > { %p1445_p3 = pnand %p1444_p2, %p1613_p10  ;;  %p1452_p7 = por %p1451_p6, %p1450_p5 }
 0x2ba   : > { %1419 = vrcp.f32 %v669_v21  ;;  %v1232_v21 = vsel %vm977_vm8, 1.0, %v1509_v4 }
 0x2bb   : > { %p1446_p4 = pneg %p1445_p3 }
 0x2bd   : > { %p1453_p8 = pnand %p1452_p7, %p1446_p4 }
 0x2c3   : > { %v1418_v22 = vpop.eup %1417 }
 0x2c7   : > { %v1420_v27 = vpop.eup %1419 }
 0x2ef   : > { %v661_v23 = vpop.f32.mrf.mxu1 }
 0x2f0   : > { %v672_v24 = vmul.f32 %v1418_v22, %v661_v23  ;;  %v1233_v22 = vsel %vm978_vm9, 1.0, %v1509_v4 }
 0x2f1   : > { %v1278_v26 = vpop.f32.mrf.mxu1 }
 0x2f2   : > { %v681_v29 = vadd.f32 %v1213_v25, %v672_v24  ;;  %v983_v24 = vadd.f32 %v1233_v22, %v1232_v21 }
 0x2f3   : > { %v664_v28 = vpop.f32.mrf.mxu1 }
 0x2f4   : > { %v673_v30 = vmul.f32 %v1420_v27, %v664_v28  ;;  %v683_v35 = vmax.f32 %v681_v29, 0.0  ;;  %v984_v27 = vrot.slane %v983_v24, 4 }
 0x2f5   : > { %v1279_v31 = vpop.f32.mrf.mxu1 }
 0x2f6   : > { %v682_v33 = vadd.f32 %v1213_v25, %v673_v30  ;;  %v985_v28 = vadd.f32 %v984_v27, %v983_v24 }
 0x2f8   : > { %v684_v36 = vmax.f32 %v682_v33, 0.0  ;;  %v986_v29 = vrot.slane %v985_v28, 2 }
 0x2fa   : > { %v685_v38 = vpack.c.bf16 %v684_v36, %v683_v35  ;;  %v987_v30 = vadd.f32 %v986_v29, %v985_v28 }
 0x2fc   : > { %815 = vmatmul.mubr.bf16.vlgmr.msra.gmra.mxu1 %v685_v38 }
 0x2fd   : > { %1281 = vmatpush3.bf16.xpose.msra.mxu1 %v685_v38  ;;  %1282 = vmatprep.mubr.msk.bf16.mxu1 %vm1510_vm0, %v1509_v4 }
 0x2fe   : > { %1286 = vmatprep.subr.bf16.mxu1 %v1509_v4 }
 0x304   : > { %1283 = vmatmul.mubr.bf16.vlgmr.msra.gmra.mxu1 %v825_v39 }
 0x305   : > { %1288 = vmatprep.mubr.msk.bf16.mxu1 %vm1510_vm0, %v1509_v4 }
 0x3bc   : > { %v816_v40 = vpop.f32.mrf.mxu1 }
 0x3be   : > { %v818_v41 = vpop.f32.mrf.mxu1 }
 0x3bf   : > { %868 = vperm.xlu1 %1356, %v818_v41  }
 0x3c0   : > { %v820_v43 = vpop.f32.mrf.mxu1 }
 0x3c1   : > { %v911_v44 = vpack.c.bf16 %v820_v43, %v816_v40 }
 0x3c2   : > { %v822_v45 = vpop.f32.mrf.mxu1 }
 0x3c3   : > { %1287 = vmatpush3.bf16.msra.mxu1 %v911_v44  ;;  %873 = vperm.xlu1 %1356, %v822_v45  }
 0x3c4   : > { %v860_v46 = vpop.f32.mrf.mxu1 }
 0x3c5   : > { %v879_v50 = vrot.slane %v860_v46, %v589_v34 }
 0x3c6   : > { %v1284_v47 = vpop.f32.mrf.mxu1 }
 0x3c8   : > { %v863_v48 = vpop.f32.mrf.mxu1 }
 0x3ca   : > { %v1285_v49 = vpop.f32.mrf.mxu1 }
 0x43a   : > { %v869_v51 = vpop.permute.xlu1 %868 }
 0x43b   : > { %v880_v52 = vadd.f32 %v879_v50, %v869_v51 }
 0x43d   : > { %v884_v53 = vmul.f32 0.2, %v880_v52  ;;  %vm882_vm6 = vcmp.gt.f32.partialorder %v880_v52, 0.0 }
 0x43e   : > { %v874_v54 = vpop.permute.xlu1 %873 }
 0x43f   : > { %v881_v55 = vadd.f32 %v879_v50, %v874_v54  ;;  %v886_v56 = vsel %vm882_vm6, %v880_v52, %v884_v53 }
 0x440   : > { %v888_v57 = vsel %vm392_vm1, %v886_v56, -1e+30 }
 0x441   : > { %v885_v58 = vmul.f32 0.2, %v881_v55  ;;  %v890_v59 = vsel %vm601_vm3, %v888_v57, -inf  ;;  %vm883_vm7 = vcmp.gt.f32.partialorder %v881_v55, 0.0 }
 0x442   : > { %891 = vmax.xlane.f32.xlu1 %v890_v59 }
 0x443   : > { %v887_v60 = vsel %vm883_vm7, %v881_v55, %v885_v58 }
 0x444   : > { %v889_v61 = vsel %vm393_vm4, %v887_v60, -1e+30  ;;  %v1018_v60 = vld [vmem:[%s1892_s10] sm:$0x1] }
 0x445   : > { %v893_v34 = vsel %vm601_vm3, %v889_v61, -inf }
 0x446   : > { %894 = vmax.xlane.f32.xlu0 %v893_v34 }
 0x4cb   : > { %v892_v62 = vpop.xlane.xlu1 %891 }
 0x4cc   : > { %v896_v63 = vsub.f32 %v888_v57, %v892_v62 }
 0x4ce   : > { %v898_v0 = vmul.f32 1.442695, %v896_v63 }
 0x4cf   : > { %v895_v1 = vpop.xlane.xlu0 %894 }
 0x4d0   : > { %1421 = vpow2.f32 %v898_v0  ;;  %v897_v3 = vsub.f32 %v889_v61, %v895_v1 }
 0x4d2   : > { %v900_v5 = vmul.f32 1.442695, %v897_v3 }
 0x4d4   : > { %1423 = vpow2.f32 %v900_v5 }
 0x4dd   : > { %v1422_v6 = vpop.eup %1421 }
 0x4de   : > { %v902_v2 = vmul.f32 %v1422_v6, %v1703_v37  ;;  %v1406_v37 = vld [vmem:[%s1891_s9 + $0x30] sm:$0xff]  }
 0x4df   : > { %1295 = vmatpush3.bf16.msra.mxu0 %v1406_v37 }
 0x4e0   : > { %v904_v7 = vsel %vm601_vm3, %v902_v2, 0.0  ;;  %1296 = vmatprep.subr.bf16.mxu0 %v1509_v4 }
 0x4e1   : > { %v1424_v8 = vpop.eup %1423  ;;  %905 = vadd.xlane.f32.xlu0 %v904_v7 }
 0x4e2   : > { %v903_v9 = vmul.f32 %v1424_v8, %v1706_v42  ;;  %v1407_v42 = vld [vmem:[%s1891_s9 + $0x28] sm:$0xff]  }
 0x4e3   : > { %1297 = vmatpush3.bf16.msra.mxu0 %v1407_v42 }
 0x4e4   : > { %v907_v10 = vsel %vm601_vm3, %v903_v9, 0.0  ;;  %v910_v11 = vpack.c.bf16 %v903_v9, %v902_v2  ;;  %1298 = vmatprep.subr.bf16.mxu0 %v1509_v4 }
 0x4e5   : > { %908 = vadd.xlane.f32.xlu0 %v907_v10 }
 0x4e6   : > { %1289 = vmatmul.mubr.msk.bf16.vlgmr.msra.gmra.mxu1 %vm601_vm3, %v910_v11 }
 0x4e7   : > { %1299 = vmatpush3.bf16.msra.mxu0 %v1408_v13 }
 0x4e8   : > { %1300 = vmatprep.subr.bf16.mxu0 %v1509_v4 }
 0x4eb   : > { %1301 = vmatpush3.bf16.msra.mxu0 %v1409_v14 }
 0x4ec   : > { %1302 = vmatprep.subr.bf16.mxu0 %v1509_v4 }
 0x4ef   : > { %1303 = vmatpush3.bf16.msra.mxu0 %v1410_v15 }
 0x4f0   : > { %1304 = vmatprep.subr.bf16.mxu0 %v1509_v4 }
 0x4f3   : > { %1305 = vmatpush3.bf16.msra.mxu0 %v1411_v16 }
 0x4f4   : > { %1306 = vmatprep.subr.bf16.mxu0 %v1509_v4  ;;  %v988_v4 = vrot.slane %v987_v30, 1 }
 0x4f6   : > { %v989_v46 = vadd.f32 %v988_v4, %v987_v30 }
 0x4f7   : > { %1307 = vmatpush3.bf16.msra.mxu0 %v1412_v17 }
 0x56a   : > { %v906_v20 = vpop.xlane.xlu0 %905 }
 0x56b   : > { %v956_v23 = vmax.f32 %v906_v20, 1.0 }
 0x56d   : > { %1425 = vrcp.f32 %v956_v23 }
 0x56e   : > { %v909_v25 = vpop.xlane.xlu0 %908 }
 0x56f   : > { %v957_v26 = vmax.f32 %v909_v25, 1.0 }
 0x571   : > { %1427 = vrcp.f32 %v957_v26 }
 0x572   : > { %1429 = vrcp.f32 %v989_v46 }
 0x57a   : > { %v1426_v31 = vpop.eup %1425 }
 0x57e   : > { %v1428_v39 = vpop.eup %1427 }
 0x57f   : > { %v1430_v56 = vpop.eup %1429 }
 0x5a6   : > { %v949_v33 = vpop.f32.mrf.mxu1 }
 0x5a7   : > { %v960_v35 = vmul.f32 %v1426_v31, %v949_v33 }
 0x5a8   : > { %v1290_v36 = vpop.f32.mrf.mxu1 }
 0x5a9   : > { %v969_v38 = vadd.f32 %v1231_v32, %v960_v35 }
 0x5aa   : > { %v952_v40 = vpop.f32.mrf.mxu1 }
 0x5ab   : > { %v961_v41 = vmul.f32 %v1428_v39, %v952_v40  ;;  %v971_v44 = vmax.f32 %v969_v38, 0.0 }
 0x5ac   : > { %v1291_v43 = vpop.f32.mrf.mxu1 }
 0x5ad   : > { %v970_v45 = vadd.f32 %v1231_v32, %v961_v41  ;;  %v990_v48 = vmul.f32 %v1232_v21, %v971_v44 }
 0x5af   : > { %v972_v47 = vmax.f32 %v970_v45, 0.0 }
 0x5b1   : > { %v991_v49 = vmul.f32 %v1233_v22, %v972_v47 }
 0x5b3   : > { %v992_v50 = vadd.f32 %v991_v49, %v990_v48 }
 0x5b5   : > { %v993_v51 = vrot.slane %v992_v50, 4 }
 0x5b7   : > { %v994_v52 = vadd.f32 %v993_v51, %v992_v50 }
 0x5b9   : > { %v995_v53 = vrot.slane %v994_v52, 2 }
 0x5bb   : > { %v996_v54 = vadd.f32 %v995_v53, %v994_v52 }
 0x5bd   : > { %v997_v55 = vrot.slane %v996_v54, 1 }
 0x5bf   : > { %v998_v57 = vadd.f32 %v997_v55, %v996_v54 }
 0x5c1   : > { %v1000_v58 = vmul.f32 %v1430_v56, %v998_v57 }
 0x5c3   : > { %v1001_v59 = vpack.c.bf16 %v1000_v58, %v1000_v58 }
 0x5c5   : > { %1309 = vmatmul.mubr.bf16.vlgmr.msra.gmra.mxu0 %v1001_v59 }
 0x685   : > { %v1101_v61 = vpop.f32.mrf.mxu0 }
 0x686   : > { %v1102_v34 = vadd.f32 %v1101_v61, %v1018_v60 }
 0x687   : > { %v1310_v62 = vpop.f32.mrf.mxu0 }
 0x688   : > { %1107 = vst [vmem:[%s373_s16] sm:$0x1] %v1102_v34 }
 0x689   : > { %v1104_v63 = vpop.f32.mrf.mxu0 }
 0x68a   : > { %1456 = shalt.err (!%p1453_p8)
}
 0x68b   : > { %s1457_s29 = scalar_lea.hbm %s1841_s0, 16  ;;  %s1461_s14 = scalar_lea.hbm %s1893_s11, 32 }
 0x68c   : > { %p1458_p9 = scmp.ne.s32.totalorder %s1841_s0, %s1457_s29  ;;  %p1462_p0 = scmp.lt.s32.totalorder %s1841_s0, %s1893_s11 }
 0x68d   : > { %p1463_p1 = scmp.lt.s32.totalorder %s1461_s14, %s1457_s29 }
 0x68e   : > { %p1459_p12 = pnand %p1458_p9, %p1613_p10 }
 0x68f   : > { %p1464_p2 = por %p1463_p1, %p1462_p0 }
 0x690   : > { %p1460_p13 = pneg %p1459_p12 }
 0x692   : > { %p1465_p3 = pnand %p1464_p2, %p1460_p13 }
 0x694   : > { %1468 = shalt.err (!%p1465_p3)
}
 0x695   : > { %1312 = dma.vmem_to_hbm [thread:$0]  (%p1613_p10), %s1843_s17, 16, %s1841_s0, %s1109_s19   ;;  %v1311_v0 = vpop.f32.mrf.mxu0 }
 0x696 PF: > { %p1318_p4 = scmp.ge.s32.totalorder %s1505_s24, 2  ;;  %s1133_s18 = sand.u32 1, %s1493_s22  }
 0x697   : > { %s1134_s20 = scalar_lea.sflag [#allocation5], %s1133_s18 }
 0x698   : > { %p1315_p5 = pnand %p1318_p4, %p1617_p11 }
 0x69a   : > { %p1316_p6 = pneg %p1315_p5 }
 0x69c   : > { %1488 = dma.done.wait (%p1316_p6), %s1134_s20, 16  }
 0x69d   : > { %1490 = vsyncadd (%p1316_p6), %s1134_s20, 4294967280  ;;  %s1899_s25 = sld [smem:[#allocation8_spill]]  ;;  %p27_p7 = scmp.ge.s32.totalorder %s1600_s27, 4  }
 0x69e   : > { %s1900_s0 = sld [smem:[#allocation9_spill]]  ;;  %s1901_s22 = smov %s1497_s23 }
 0x69f   : > { %s1903_s24 = smov %s1600_s27  ;;  %29 = sbr.rel (!%p27_p7) target bundleno = 18 (0x12), region = 98 }
 0x6a3   : > { %s1902_s23 = smov %s1899_s25 }
 0x6a4   :  { %1138 = vsyncpa [#allocation5], 1 }
 0x6a5   :  { %1140 = vsyncpa [#allocation5 + $0x1], 1 }

</bundles_post_ra>
